<compile_context>
chip_gen: v7x
topology: tpu7x:2x2x1
jax: 0.10.0
libtpu: 0.0.40
codegen_flags: <defaults>
</compile_context>

<pallas_src>
import random

import jax
import jax.numpy as jnp
from jax.experimental import pallas as pl
from jax.experimental.pallas import tpu as pltpu

MAX_BRANCH = 6

_LANE = 128
_MIB = 1024 * 1024
_MAX_BLOCK_BYTES = 8 * _MIB  # per-buffer ceiling; diminishing returns beyond this

# Returning the original array as clone #0 drops total HBM traffic from (1+num)
# to num passes -- the largest single win for a bandwidth-bound broadcast copy.
# Safe because JAX arrays are immutable.
# TODO(synk): differs from torch .clone() buffer-identity semantics; set False if
# a downstream consumer relies on donation / distinct buffers for every clone.
_ALIAS_FIRST_CLONE = True


def _cdiv(a: int, b: int) -> int:
    return -(-a // b)


def _round_up(a: int, b: int) -> int:
    return _cdiv(a, b) * b


def _vmem_caps():
    """(physical VMEM bytes, per-call buffer budget bytes) for this chip."""
    try:
        cap = int(pltpu.get_tpu_info().vmem_capacity_bytes)
    except Exception:
        cap = 64 * _MIB  # conservative default (v7x per-TensorCore VMEM)
    # Buffer budget: ~5/8 of physical, capped at 40 MiB (fits v7x's 64 MiB).
    budget = min(40 * _MIB, (cap * 5) // 8)
    return cap, budget


def _make_branch_kernel(n_out: int):
    def kernel(x_ref, *out_refs):
        v = x_ref[...]
        for o in out_refs:
            o[...] = v

    return kernel


def _choose_lanes(total: int, sub: int):
    """Pick a lane width (multiple of 128). Prefer exact divisibility (no pad)."""
    for cand in (4096, 2048, 1024, 512, 256, 128):
        if total >= cand and total % cand == 0:
            return cand, False
    for cand in (4096, 2048, 1024, 512, 256, 128):
        if total >= cand * sub * 2:
            return cand, True
    return _LANE, True


def _plan_2d(total: int, itemsize: int, n_bufs: int):
    """Return (rows, lanes, tile_rows, grid0, padded_total, vmem_limit_bytes)."""
    # Minimum sublane multiple depends on dtype packing (f32:8, bf16:16, int8:32).
    sub = {4: 8, 2: 16, 1: 32}.get(itemsize, 8)
    lanes, needs_pad = _choose_lanes(total, sub)
    padded_total = _round_up(total, lanes * sub) if needs_pad else total
    rows = padded_total // lanes

    cap, budget = _vmem_caps()
    # Double-buffered (1 input + n_copies outputs) blocks must fit the budget.
    block_bytes = budget // (2 * n_bufs)
    block_bytes = min(block_bytes, _MAX_BLOCK_BYTES)
    block_bytes = max(block_bytes, sub * lanes * itemsize)

    max_tile_rows = max(sub, (block_bytes // (lanes * itemsize)) // sub * sub)

    if rows <= sub:
        tile_rows = rows  # single block == full array dims (always legal)
    else:
        # Keep at least 2 grid steps so both v7x TensorCores get work and the
        # DMA pipeline has something to overlap.
        tile_rows = min(max_tile_rows, _round_up(_cdiv(rows, 2), sub))
    grid0 = _cdiv(rows, tile_rows)

    # Best-effort: prefer an even number of steps for 2-core sharding.
    if grid0 > 2 and grid0 % 2 == 1:
        alt = _round_up(_cdiv(rows, grid0 + 1), sub)
        if alt >= sub and _cdiv(rows, alt) % 2 == 0:
            tile_rows, grid0 = alt, _cdiv(rows, alt)

    usage = 2 * n_bufs * tile_rows * lanes * itemsize
    vmem_limit = int(min((cap * 3) // 4, max(32 * _MIB, usage + 16 * _MIB)))
    return rows, lanes, tile_rows, grid0, padded_total, vmem_limit


def _branch_copy(x: jax.Array, num: int):
    """Return `num` clones of x; copies come from one multi-output Pallas kernel."""
    orig_shape = x.shape
    dtype = x.dtype
    itemsize = jnp.dtype(dtype).itemsize
    total = int(x.size)

    n_copies = num - 1 if _ALIAS_FIRST_CLONE else num
    if n_copies <= 0:
        return (x,)

    rows, lanes, tile_rows, grid0, padded_total, vmem_limit = _plan_2d(
        total, itemsize, n_copies + 1
    )

    x_flat = x.reshape(-1)
    if padded_total != total:
        x_flat = jnp.pad(x_flat, (0, padded_total - total))
    x2d = x_flat.reshape(rows, lanes)

    out_shape = tuple(
        jax.ShapeDtypeStruct((rows, lanes), dtype) for _ in range(n_copies)
    )
    in_spec = pl.BlockSpec((tile_rows, lanes), lambda i: (i, 0))
    out_specs = tuple(
        pl.BlockSpec((tile_rows, lanes), lambda i: (i, 0)) for _ in range(n_copies)
    )

    outs = pl.pallas_call(
        _make_branch_kernel(n_copies),
        out_shape=out_shape,
        grid=(grid0,),
        in_specs=[in_spec],
        out_specs=out_specs,
        compiler_params=pltpu.CompilerParams(
            dimension_semantics=("parallel",),
            vmem_limit_bytes=vmem_limit,
        ),
        cost_estimate=pl.CostEstimate(
            flops=0,
            transcendentals=0,
            bytes_accessed=(n_copies + 1) * padded_total * itemsize,
        ),
    )(x2d)

    if not isinstance(outs, (tuple, list)):
        outs = (outs,)

    if padded_total != total:
        copies = tuple(o.reshape(-1)[:total].reshape(orig_shape) for o in outs)
    else:
        copies = tuple(o.reshape(orig_shape) for o in outs)

    return ((x,) + copies) if _ALIAS_FIRST_CLONE else copies


class BranchPallas:
    """JAX/Pallas equivalent of the PyTorch `Branch` node."""

    def __init__(self, input_tensors, grow_up: bool = False, num: int = None):
        if not grow_up:
            assert len(input_tensors) == 1, (
                f"Branch only has one input, got {len(input_tensors)} inputs."
            )
        self.input_tensors = list(input_tensors)
        self.num = num if num is not None else random.randint(2, MAX_BRANCH)
        self.output_tensors = [self.input_tensors[0] for _ in range(self.num)]

    def __str__(self):
        return "Branch"

    def __call__(self, x):
        # forward(x) -> tuple of `num` clones of x.
        return _branch_copy(x, self.num)


if __name__ == "__main__":
    random.seed(0)  # deterministic branch count
    key = jax.random.PRNGKey(0)

    # NCHW conv-style input consistent with the search space.
    x = jax.random.normal(key, (2, 4, 16, 16), dtype=jnp.float32)

    node = BranchPallas([x])
    outs = jax.block_until_ready(node(x))

    assert isinstance(outs, tuple) and len(outs) == node.num
    for o in outs:
        assert o.shape == x.shape
        assert o.dtype == x.dtype
        assert bool(jnp.array_equal(o, x))

    # Exercise the padded (non-128-divisible) path.
    x_odd = jax.random.normal(jax.random.PRNGKey(1), (2, 3, 7, 5), dtype=jnp.float32)
    outs_odd = jax.block_until_ready(BranchPallas([x_odd], num=3)(x_odd))
    assert len(outs_odd) == 3
    for o in outs_odd:
        assert o.shape == x_odd.shape and o.dtype == x_odd.dtype
        assert bool(jnp.array_equal(o, x_odd))

    # Exercise the multi-step tiled path (grid >= 2).
    x_mid = jax.random.normal(jax.random.PRNGKey(2), (8, 64, 32, 32), dtype=jnp.float32)
    outs_mid = jax.block_until_ready(BranchPallas([x_mid], num=4)(x_mid))
    assert len(outs_mid) == 4
    for o in outs_mid:
        assert o.shape == x_mid.shape and o.dtype == x_mid.dtype
        assert bool(jnp.array_equal(o, x_mid))

    print("KERNEL_OK")
</pallas_src>

<mosaic_0001>
module attributes {stable_mosaic.version = 11 : i64} {
  func.func @kernel(%arg0: i32, %arg1: memref<1x2048xf32, #tpu.memory_space<vmem>>, %arg2: memref<1x2048xf32, #tpu.memory_space<vmem>>, %arg3: memref<1x2048xf32, #tpu.memory_space<vmem>>, %arg4: memref<1x2048xf32, #tpu.memory_space<vmem>>, %arg5: memref<1x2048xf32, #tpu.memory_space<vmem>>) attributes {dimension_semantics = [#tpu.dimension_semantics<parallel>], iteration_bounds = array<i64: 1>, scalar_prefetch = 0 : i64, scratch_operands = 0 : i64, tpu.core_type = #tpu.core_type<tc>, window_params = [{transform_indices = @transform_0, window_bounds = array<i64: 1, 2048>}, {transform_indices = @transform_1, window_bounds = array<i64: 1, 2048>}, {transform_indices = @transform_2, window_bounds = array<i64: 1, 2048>}, {transform_indices = @transform_3, window_bounds = array<i64: 1, 2048>}, {transform_indices = @transform_4, window_bounds = array<i64: 1, 2048>}]} {
    %c0 = arith.constant 0 : index
    %c0_0 = arith.constant 0 : index
    %0 = vector.load %arg1[%c0, %c0_0] : memref<1x2048xf32, #tpu.memory_space<vmem>>, vector<1x2048xf32>
    %c0_1 = arith.constant 0 : index
    %c0_2 = arith.constant 0 : index
    %1 = vector.load %arg2[%c0_1, %c0_2] : memref<1x2048xf32, #tpu.memory_space<vmem>>, vector<1x2048xf32>
    tpu.vector_store %arg2[%c0_1, %c0_2], %0 {strides = array<i32>} : memref<1x2048xf32, #tpu.memory_space<vmem>>, vector<1x2048xf32>,
    %c0_3 = arith.constant 0 : index
    %c0_4 = arith.constant 0 : index
    %2 = vector.load %arg3[%c0_3, %c0_4] : memref<1x2048xf32, #tpu.memory_space<vmem>>, vector<1x2048xf32>
    tpu.vector_store %arg3[%c0_3, %c0_4], %0 {strides = array<i32>} : memref<1x2048xf32, #tpu.memory_space<vmem>>, vector<1x2048xf32>,
    %c0_5 = arith.constant 0 : index
    %c0_6 = arith.constant 0 : index
    %3 = vector.load %arg4[%c0_5, %c0_6] : memref<1x2048xf32, #tpu.memory_space<vmem>>, vector<1x2048xf32>
    tpu.vector_store %arg4[%c0_5, %c0_6], %0 {strides = array<i32>} : memref<1x2048xf32, #tpu.memory_space<vmem>>, vector<1x2048xf32>,
    %c0_7 = arith.constant 0 : index
    %c0_8 = arith.constant 0 : index
    %4 = vector.load %arg5[%c0_7, %c0_8] : memref<1x2048xf32, #tpu.memory_space<vmem>>, vector<1x2048xf32>
    tpu.vector_store %arg5[%c0_7, %c0_8], %0 {strides = array<i32>} : memref<1x2048xf32, #tpu.memory_space<vmem>>, vector<1x2048xf32>,
    return
  }
  func.func @transform_0(%arg0: i32) -> (i32, i32) {
    %c0_i32 = arith.constant 0 : i32
    %c0_i32_0 = arith.constant 0 : i32
    return %arg0, %c0_i32 : i32, i32
  }
  func.func @transform_1(%arg0: i32) -> (i32, i32) {
    %c0_i32 = arith.constant 0 : i32
    %c0_i32_0 = arith.constant 0 : i32
    return %arg0, %c0_i32 : i32, i32
  }
  func.func @transform_2(%arg0: i32) -> (i32, i32) {
    %c0_i32 = arith.constant 0 : i32
    %c0_i32_0 = arith.constant 0 : i32
    return %arg0, %c0_i32 : i32, i32
  }
  func.func @transform_3(%arg0: i32) -> (i32, i32) {
    %c0_i32 = arith.constant 0 : i32
    %c0_i32_0 = arith.constant 0 : i32
    return %arg0, %c0_i32 : i32, i32
  }
  func.func @transform_4(%arg0: i32) -> (i32, i32) {
    %c0_i32 = arith.constant 0 : i32
    %c0_i32_0 = arith.constant 0 : i32
    return %arg0, %c0_i32 : i32, i32
  }
}

</mosaic_0001>

<bundles_post_ra>
// kernel: tpu_custom_call.1
= control target key start
LH: loop header
LB: loop body
LE: loop exit
PB: predicated region body
PF: predicated region fallthrough
CT: control target
= control target key end

     0   :  { %10 = vsyncpa [#allocation3], 0  ;;  %s327_s0 = inlined_call_operand.hbm [shape: f32[1,2048], index: 0, kind: input, shape index: {}]   ;;  %s328_s1 = inlined_call_operand.hbm [shape: f32[1,2048], index: 1, kind: output, shape index: {0}]   ;;  %s329_s2 = inlined_call_operand.hbm [shape: f32[1,2048], index: 2, kind: output, shape index: {1}]   ;;  %s330_s3 = inlined_call_operand.hbm [shape: f32[1,2048], index: 3, kind: output, shape index: {2}]   ;;  %s331_s4 = inlined_call_operand.hbm [shape: f32[1,2048], index: 4, kind: output, shape index: {3}]  }
   0x1   :  { %11 = vsyncpa [#allocation4], 0 }
   0x2   :  { %12 = vsyncpa [#allocation7], 0 }
   0x3   :  { %13 = vsyncpa [#allocation10], 0  ;;  %s216_s15 = smov [#allocation2]   ;;  %s98_s19 = scalar_lea.hbm %s327_s0, 256 }
   0x4   :  { %s20_s16 = sshll.u32 %s216_s15, 4  ;;  %p99_p0 = scmp.ne.s32.totalorder %s327_s0, %s98_s19  ;;  %s21_s16 = int_to_ptr.vmem [resolvable:$true] %s20_s16 }
   0x5   :  { %p102_p1 = scmp.lt.u32.totalorder %s98_s19, %s327_s0 }
   0x7   :  { %p104_p2 = pnand %p102_p1, %p99_p0 }
   0x9   :  { %107 = shalt.err (!%p104_p2)
}
   0xa   :  { %s108_s24 = scalar_lea.vmem %s21_s16, 256  ;;  %p113_p4 = scmp.lt.s32.totalorder %s21_s16, %s21_s16 }
   0xb   :  { %p109_p3 = scmp.ne.s32.totalorder %s21_s16, %s108_s24  ;;  %p114_p5 = scmp.lt.s32.totalorder %s108_s24, %s108_s24 }
   0xd   :  { %p115_p6 = por %p114_p5, %p113_p4 }
   0xf   :  { %p116_p7 = pnand %p115_p6, %p109_p3 }
  0x11   :  { %119 = shalt.err (!%p116_p7)
}
  0x12   :  { %23 = dma.hbm_to_vmem [thread:$0]  %s327_s0, 256, %s21_s16, [#allocation3]  }
  0x13   :  { %208 = dma.done.wait [#allocation3], 256  }
  0x14   :  { %209 = vsyncadd [#allocation3], 4294967040  ;;  %s217_s27 = smov [#allocation6]   ;;  %s218_s29 = smov [#allocation5]   ;;  %v27_v0 = vld [vmem:[#allocation2] sm:$0xff]  ;;  %v28_v1 = vld [vmem:[#allocation2 + $0x8] sm:$0xff] }
  0x15   :  { %s53_s28 = sshll.u32 %s217_s27, 4  ;;  %s43_s30 = sshll.u32 %s218_s29, 4  ;;  %31 = vst [vmem:[#allocation6] sm:$0xff] %v27_v0  ;;  %29 = vst [vmem:[#allocation5] sm:$0xff] %v27_v0  ;;  %s54_s28 = int_to_ptr.vmem [resolvable:$true] %s53_s28  ;;  %s258_s30 = int_to_ptr.vmem [resolvable:$true] %s43_s30 }
  0x16   :  { %s219_s5 = smov [#allocation8]   ;;  %s220_s7 = smov [#allocation9]   ;;  %33 = vst [vmem:[#allocation8] sm:$0xff] %v27_v0  ;;  %35 = vst [vmem:[#allocation9] sm:$0xff] %v27_v0 }
  0x17   :  { %s63_s6 = sshll.u32 %s219_s5, 4  ;;  %s73_s8 = sshll.u32 %s220_s7, 4  ;;  %32 = vst [vmem:[#allocation6 + $0x8] sm:$0xff] %v28_v1  ;;  %30 = vst [vmem:[#allocation5 + $0x8] sm:$0xff] %v28_v1  ;;  %s260_s6 = int_to_ptr.vmem [resolvable:$true] %s63_s6  ;;  %s262_s8 = int_to_ptr.vmem [resolvable:$true] %s73_s8 }
  0x18   :  { %34 = vst [vmem:[#allocation8 + $0x8] sm:$0xff] %v28_v1  ;;  %36 = vst [vmem:[#allocation9 + $0x8] sm:$0xff] %v28_v1  ;;  %s120_s0 = scalar_lea.vmem %s54_s28, 256  ;;  %p125_p9 = scmp.lt.s32.totalorder %s54_s28, %s54_s28 }
  0x19   :  { %p121_p8 = scmp.ne.s32.totalorder %s54_s28, %s120_s0  ;;  %p126_p10 = scmp.lt.s32.totalorder %s120_s0, %s120_s0 }
  0x1b   :  { %p127_p11 = por %p126_p10, %p125_p9 }
  0x1d   :  { %p128_p12 = pnand %p127_p11, %p121_p8 }
  0x1f   :  { %131 = shalt.err (!%p128_p12)
}
  0x20   :  { %s132_s11 = scalar_lea.hbm %s329_s2, 256 }
  0x21   :  { %p133_p13 = scmp.ne.s32.totalorder %s329_s2, %s132_s11  ;;  %p136_p0 = scmp.lt.u32.totalorder %s132_s11, %s329_s2 }
  0x23   :  { %p138_p1 = pnand %p136_p0, %p133_p13 }
  0x25   :  { %141 = shalt.err (!%p138_p1)
}
  0x26   :  { %56 = dma.vmem_to_hbm [thread:$0]  %s54_s28, 256, %s329_s2, [#allocation7]  }
  0x27   :  { %s142_s18 = scalar_lea.vmem %s258_s30, 256  ;;  %p147_p3 = scmp.lt.s32.totalorder %s258_s30, %s258_s30 }
  0x28   :  { %p143_p2 = scmp.ne.s32.totalorder %s258_s30, %s142_s18  ;;  %p148_p4 = scmp.lt.s32.totalorder %s142_s18, %s142_s18 }
  0x2a   :  { %p149_p5 = por %p148_p4, %p147_p3 }
  0x2c   :  { %p150_p6 = pnand %p149_p5, %p143_p2 }
  0x2e   :  { %153 = shalt.err (!%p150_p6)
}
  0x2f   :  { %s154_s21 = scalar_lea.hbm %s328_s1, 256 }
  0x30   :  { %p155_p7 = scmp.ne.s32.totalorder %s328_s1, %s154_s21  ;;  %p158_p8 = scmp.lt.u32.totalorder %s154_s21, %s328_s1 }
  0x32   :  { %p160_p9 = pnand %p158_p8, %p155_p7 }
  0x34   :  { %163 = shalt.err (!%p160_p9)
}
  0x35   :  { %46 = dma.vmem_to_hbm [thread:$0]  %s258_s30, 256, %s328_s1, [#allocation4]  }
  0x36   :  { %s164_s27 = scalar_lea.vmem %s260_s6, 256  ;;  %p169_p11 = scmp.lt.s32.totalorder %s260_s6, %s260_s6 }
  0x37   :  { %p165_p10 = scmp.ne.s32.totalorder %s260_s6, %s164_s27  ;;  %p170_p12 = scmp.lt.s32.totalorder %s164_s27, %s164_s27 }
  0x39   :  { %p171_p13 = por %p170_p12, %p169_p11 }
  0x3b   :  { %p172_p0 = pnand %p171_p13, %p165_p10 }
  0x3d   :  { %175 = shalt.err (!%p172_p0)
}
  0x3e   :  { %s176_s5 = scalar_lea.hbm %s330_s3, 256 }
  0x3f   :  { %p177_p1 = scmp.ne.s32.totalorder %s330_s3, %s176_s5  ;;  %p180_p2 = scmp.lt.u32.totalorder %s176_s5, %s330_s3 }
  0x41   :  { %p182_p3 = pnand %p180_p2, %p177_p1 }
  0x43   :  { %185 = shalt.err (!%p182_p3)
}
  0x44   :  { %66 = dma.vmem_to_hbm [thread:$0]  %s260_s6, 256, %s330_s3, [#allocation7]  }
  0x45   :  { %s186_s11 = scalar_lea.vmem %s262_s8, 256  ;;  %p191_p5 = scmp.lt.s32.totalorder %s262_s8, %s262_s8 }
  0x46   :  { %p187_p4 = scmp.ne.s32.totalorder %s262_s8, %s186_s11  ;;  %p192_p6 = scmp.lt.s32.totalorder %s186_s11, %s186_s11 }
  0x48   :  { %p193_p7 = por %p192_p6, %p191_p5 }
  0x4a   :  { %p194_p8 = pnand %p193_p7, %p187_p4 }
  0x4c   :  { %197 = shalt.err (!%p194_p8)
}
  0x4d   :  { %s198_s14 = scalar_lea.hbm %s331_s4, 256 }
  0x4e   :  { %p199_p9 = scmp.ne.s32.totalorder %s331_s4, %s198_s14  ;;  %p202_p10 = scmp.lt.u32.totalorder %s198_s14, %s331_s4 }
  0x50   :  { %p204_p11 = pnand %p202_p10, %p199_p9 }
  0x52   :  { %207 = shalt.err (!%p204_p11)
}
  0x53   :  { %76 = dma.vmem_to_hbm [thread:$0]  %s262_s8, 256, %s331_s4, [#allocation10]  }
  0x54   :  { %210 = dma.done.wait [#allocation4], 256  }
  0x55   :  { %211 = vsyncadd [#allocation4], 4294967040 }
  0x56   :  { %212 = dma.done.wait [#allocation7], 512  }
  0x57   :  { %213 = vsyncadd [#allocation7], 4294966784 }
  0x58   :  { %214 = dma.done.wait [#allocation10], 256  }
  0x59   :  { %215 = vsyncadd [#allocation10], 4294967040 }
  0x5a   :  { %89 = vsyncpa [#allocation3], 1 }
  0x5b   :  { %90 = vsyncpa [#allocation4], 1 }
  0x5c   :  { %91 = vsyncpa [#allocation7], 1 }
  0x5d   :  { %92 = vsyncpa [#allocation10], 1 }

</bundles_post_ra>
